<compile_context>
chip_gen: v6e
topology: v6e:2x2x1
jax: 0.10.0
libtpu: 0.0.40
codegen_flags: <defaults>
</compile_context>

<pallas_src>
import functools

import jax
import jax.numpy as jnp
from jax.experimental import pallas as pl
from jax.experimental.pallas import tpu as pltpu

_LANE = 128
_SUBLANE = 8


def _round_up(x, m):
    return ((x + m - 1) // m) * m


# ----------------------------------------------------------------------------
# Pallas kernel: elementwise IRT response probability.
#   out_refs = (prob,)                       when use_sigmoid=False
#   out_refs = (prob, b_sig, theta_sig)      when use_sigmoid=True
# ----------------------------------------------------------------------------
def irt_kernel(theta_ref, disc_ref, b_ref, *out_refs,
               ratio, a_range, use_sigmoid):
    theta = theta_ref[...]                                   # [tr, 128]
    b = b_ref[...]                                           # [tr, 128]
    a = jax.nn.sigmoid(disc_ref[...]) * a_range              # discrimination

    if use_sigmoid:                                          # static python flag
        theta = jax.nn.sigmoid(theta)
        b = jax.nn.sigmoid(b)

    # p = 1 / (1 + exp(-ratio * a * (theta - b)))  -- exact, stable logistic.
    p = jax.nn.sigmoid(ratio * a * (theta - b))

    out_refs[0][...] = p.astype(out_refs[0].dtype)
    if use_sigmoid:
        out_refs[1][...] = b.astype(out_refs[1].dtype)
        out_refs[2][...] = theta.astype(out_refs[2].dtype)


# ----------------------------------------------------------------------------
# Parameter construction (mirrors IRT.__init__ : three [N, 1] embeddings,
# xavier_normal_ on every 'weight').
# ----------------------------------------------------------------------------
def init_irt_params(key, student_n, exer_n):
    ks = jax.random.split(key, 3)

    def xavier_normal(k, shape):
        fan_out, fan_in = shape
        std = (2.0 / (fan_in + fan_out)) ** 0.5
        return std * jax.random.normal(k, shape, dtype=jnp.float32)

    return {
        "student_emb": xavier_normal(ks[0], (student_n, 1)),  # theta
        "proj_disc":   xavier_normal(ks[1], (exer_n, 1)),     # a (pre-sigmoid)
        "proj_diff":   xavier_normal(ks[2], (exer_n, 1)),     # b
    }


# ----------------------------------------------------------------------------
# Wrapper: id padding -> slab-shaped gathers (XLA glue) -> gridded pallas_call.
# ----------------------------------------------------------------------------
def irt_forward(params, stu_id, exer_id, *, ratio=1.703, a_range=1.0,
                use_sigmoid=False, tile_rows=4096, out_dtype=jnp.float32):
    B = stu_id.shape[0]

    # Lane-dense layout: pad B up to rows*128, rows a multiple of the row tile.
    rows_needed = pl.cdiv(B, _LANE)
    tr = min(int(tile_rows), _round_up(rows_needed, _SUBLANE))
    tr = _round_up(tr, _SUBLANE)
    rows = _round_up(rows_needed, tr)
    b_pad = rows * _LANE
    needs_pad = (b_pad != B)

    def prep_ids(ids):
        ids = ids.astype(jnp.int32)
        if needs_pad:
            ids = jnp.pad(ids, (0, b_pad - B))        # pad with valid index 0
        return ids.reshape(rows, _LANE)

    stu2d = prep_ids(stu_id)
    exer2d = prep_ids(exer_id)

    # Embedding lookups (feature dim is 1) directly into [rows, 128] slabs.
    theta2d = jnp.take(params["student_emb"][:, 0], stu2d, axis=0)
    disc2d = jnp.take(params["proj_disc"][:, 0], exer2d, axis=0)
    bdiff2d = jnp.take(params["proj_diff"][:, 0], exer2d, axis=0)

    grid = (rows // tr,)
    spec = pl.BlockSpec((tr, _LANE), lambda i: (i, 0))

    if use_sigmoid:
        out_shape = (
            jax.ShapeDtypeStruct((rows, _LANE), out_dtype),     # probabilities
            jax.ShapeDtypeStruct((rows, _LANE), jnp.float32),   # sigmoid(b)
            jax.ShapeDtypeStruct((rows, _LANE), jnp.float32),   # sigmoid(theta)
        )
        out_specs = (spec, spec, spec)
    else:
        out_shape = jax.ShapeDtypeStruct((rows, _LANE), out_dtype)
        out_specs = spec

    kernel = functools.partial(
        irt_kernel,
        ratio=float(ratio),
        a_range=float(a_range),
        use_sigmoid=bool(use_sigmoid),
    )

    def call(dim_sem):
        return pl.pallas_call(
            kernel,
            out_shape=out_shape,
            grid=grid,
            in_specs=[spec, spec, spec],
            out_specs=out_specs,
            compiler_params=pltpu.CompilerParams(
                dimension_semantics=dim_sem,
                vmem_limit_bytes=32 * 1024 * 1024,   # >> double-buffered need
            ),
        )(theta2d, disc2d, bdiff2d)

    # CORE_PARALLEL shards the row-tile loop across v7x's two TensorCores
    # (the only semantics that changes codegen); fall back to PARALLEL if the
    # target's Mosaic lowering rejects it.  (Fallback only engages when this
    # wrapper runs eagerly, which is how it is used here.)
    try:
        result = call((pltpu.CORE_PARALLEL,))
        jax.block_until_ready(result)
    except Exception:
        result = call((pltpu.PARALLEL,))

    if use_sigmoid:
        out2d, b2d, th2d = result
    else:
        out2d = result
        b2d, th2d = bdiff2d, theta2d        # pass-throughs never enter the kernel

    out = out2d.reshape(-1)
    b_flat = b2d.reshape(-1)
    th_flat = th2d.reshape(-1)
    if needs_pad:
        out = out[:B]
        b_flat = b_flat[:B]
        th_flat = th_flat[:B]

    # Match the PyTorch return: (output.squeeze(), b [B,1], theta [B,1]).
    return out, b_flat.reshape(B, 1), th_flat.reshape(B, 1)


# ----------------------------------------------------------------------------
if __name__ == "__main__":
    student_n, exer_n = 20, 30
    B = 8
    ratio, a_range = 1.703, 1.0

    key = jax.random.PRNGKey(0)
    k_param, k_stu, k_exer = jax.random.split(key, 3)

    params = init_irt_params(k_param, student_n, exer_n)
    stu_id = jax.random.randint(k_stu, (B,), 0, student_n, dtype=jnp.int32)
    exer_id = jax.random.randint(k_exer, (B,), 0, exer_n, dtype=jnp.int32)

    # Pure-JAX reference pieces.
    theta_r = jnp.take(params["student_emb"][:, 0], stu_id)
    a_r = jax.nn.sigmoid(jnp.take(params["proj_disc"][:, 0], exer_id)) * a_range
    b_r = jnp.take(params["proj_diff"][:, 0], exer_id)

    # --- default path: use_sigmoid=False ------------------------------------
    out, b, theta = irt_forward(params, stu_id, exer_id,
                                ratio=ratio, a_range=a_range, use_sigmoid=False)
    jax.block_until_ready((out, b, theta))

    out_r = 1.0 / (1.0 + jnp.exp(-ratio * a_r * (theta_r - b_r)))
    assert out.shape == (B,) and b.shape == (B, 1) and theta.shape == (B, 1)
    assert bool(jnp.all(jnp.abs(out - out_r) < 1e-5))
    assert bool(jnp.all(jnp.abs(b[:, 0] - b_r) < 1e-6))
    assert bool(jnp.all(jnp.abs(theta[:, 0] - theta_r) < 1e-6))
    assert bool(jnp.all((out >= 0.0) & (out <= 1.0)))

    # --- sigmoid-transformed path: use_sigmoid=True -------------------------
    out_s, b_s, theta_s = irt_forward(params, stu_id, exer_id,
                                      ratio=ratio, a_range=a_range,
                                      use_sigmoid=True)
    jax.block_until_ready((out_s, b_s, theta_s))

    theta_rs, b_rs = jax.nn.sigmoid(theta_r), jax.nn.sigmoid(b_r)
    out_rs = 1.0 / (1.0 + jnp.exp(-ratio * a_r * (theta_rs - b_rs)))
    assert bool(jnp.all(jnp.abs(out_s - out_rs) < 1e-5))
    assert bool(jnp.all(jnp.abs(b_s[:, 0] - b_rs) < 1e-5))
    assert bool(jnp.all(jnp.abs(theta_s[:, 0] - theta_rs) < 1e-5))

    print("KERNEL_OK")
</pallas_src>

<mosaic_0001>
module attributes {stable_mosaic.version = 11 : i64} {
  func.func @irt_kernel(%arg0: i32, %arg1: memref<8x128xf32, #tpu.memory_space<vmem>>, %arg2: memref<8x128xf32, #tpu.memory_space<vmem>>, %arg3: memref<8x128xf32, #tpu.memory_space<vmem>>, %arg4: memref<8x128xf32, #tpu.memory_space<vmem>>) attributes {dimension_semantics = [#tpu.dimension_semantics<core_parallel>], iteration_bounds = array<i64: 1>, scalar_prefetch = 0 : i64, scratch_operands = 0 : i64, tpu.core_type = #tpu.core_type<tc>, window_params = [{transform_indices = @transform_0, window_bounds = array<i64: 8, 128>}, {transform_indices = @transform_1, window_bounds = array<i64: 8, 128>}, {transform_indices = @transform_2, window_bounds = array<i64: 8, 128>}, {transform_indices = @transform_3, window_bounds = array<i64: 8, 128>}]} {
    %c0 = arith.constant 0 : index
    %c0_0 = arith.constant 0 : index
    %0 = vector.load %arg1[%c0, %c0_0] : memref<8x128xf32, #tpu.memory_space<vmem>>, vector<8x128xf32>
    %c0_1 = arith.constant 0 : index
    %c0_2 = arith.constant 0 : index
    %1 = vector.load %arg3[%c0_1, %c0_2] : memref<8x128xf32, #tpu.memory_space<vmem>>, vector<8x128xf32>
    %c0_3 = arith.constant 0 : index
    %c0_4 = arith.constant 0 : index
    %2 = vector.load %arg2[%c0_3, %c0_4] : memref<8x128xf32, #tpu.memory_space<vmem>>, vector<8x128xf32>
    %3 = arith.negf %2 : vector<8x128xf32>
    %4 = math.exp %3 : vector<8x128xf32>
    %cst = arith.constant 1.000000e+00 : f32
    %5 = vector.broadcast %cst : f32 to vector<8x128xf32>
    %6 = arith.addf %5, %4 : vector<8x128xf32>
    %7 = arith.divf %5, %6 : vector<8x128xf32>
    %cst_5 = arith.constant 1.000000e+00 : f32
    %8 = vector.broadcast %cst_5 : f32 to vector<8x128xf32>
    %9 = arith.mulf %7, %8 : vector<8x128xf32>
    %cst_6 = arith.constant 1.703000e+00 : f32
    %10 = vector.broadcast %cst_6 : f32 to vector<8x128xf32>
    %11 = arith.mulf %10, %9 : vector<8x128xf32>
    %12 = arith.subf %0, %1 : vector<8x128xf32>
    %13 = arith.mulf %11, %12 : vector<8x128xf32>
    %14 = arith.negf %13 : vector<8x128xf32>
    %15 = math.exp %14 : vector<8x128xf32>
    %cst_7 = arith.constant 1.000000e+00 : f32
    %16 = vector.broadcast %cst_7 : f32 to vector<8x128xf32>
    %17 = arith.addf %16, %15 : vector<8x128xf32>
    %18 = arith.divf %16, %17 : vector<8x128xf32>
    %c0_8 = arith.constant 0 : index
    %c0_9 = arith.constant 0 : index
    %19 = vector.load %arg4[%c0_8, %c0_9] : memref<8x128xf32, #tpu.memory_space<vmem>>, vector<8x128xf32>
    tpu.vector_store %arg4[%c0_8, %c0_9], %18 {strides = array<i32>} : memref<8x128xf32, #tpu.memory_space<vmem>>, vector<8x128xf32>,
    return
  }
  func.func @transform_0(%arg0: i32) -> (i32, i32) {
    %c0_i32 = arith.constant 0 : i32
    %c0_i32_0 = arith.constant 0 : i32
    return %arg0, %c0_i32 : i32, i32
  }
  func.func @transform_1(%arg0: i32) -> (i32, i32) {
    %c0_i32 = arith.constant 0 : i32
    %c0_i32_0 = arith.constant 0 : i32
    return %arg0, %c0_i32 : i32, i32
  }
  func.func @transform_2(%arg0: i32) -> (i32, i32) {
    %c0_i32 = arith.constant 0 : i32
    %c0_i32_0 = arith.constant 0 : i32
    return %arg0, %c0_i32 : i32, i32
  }
  func.func @transform_3(%arg0: i32) -> (i32, i32) {
    %c0_i32 = arith.constant 0 : i32
    %c0_i32_0 = arith.constant 0 : i32
    return %arg0, %c0_i32 : i32, i32
  }
}

module attributes {stable_mosaic.version = 11 : i64} {
  func.func @irt_kernel(%arg0: i32, %arg1: memref<8x128xf32, #tpu.memory_space<vmem>>, %arg2: memref<8x128xf32, #tpu.memory_space<vmem>>, %arg3: memref<8x128xf32, #tpu.memory_space<vmem>>, %arg4: memref<8x128xf32, #tpu.memory_space<vmem>>) attributes {dimension_semantics = [#tpu.dimension_semantics<parallel>], iteration_bounds = array<i64: 1>, scalar_prefetch = 0 : i64, scratch_operands = 0 : i64, tpu.core_type = #tpu.core_type<tc>, window_params = [{transform_indices = @transform_0, window_bounds = array<i64: 8, 128>}, {transform_indices = @transform_1, window_bounds = array<i64: 8, 128>}, {transform_indices = @transform_2, window_bounds = array<i64: 8, 128>}, {transform_indices = @transform_3, window_bounds = array<i64: 8, 128>}]} {
    %c0 = arith.constant 0 : index
    %c0_0 = arith.constant 0 : index
    %0 = vector.load %arg1[%c0, %c0_0] : memref<8x128xf32, #tpu.memory_space<vmem>>, vector<8x128xf32>
    %c0_1 = arith.constant 0 : index
    %c0_2 = arith.constant 0 : index
    %1 = vector.load %arg3[%c0_1, %c0_2] : memref<8x128xf32, #tpu.memory_space<vmem>>, vector<8x128xf32>
    %c0_3 = arith.constant 0 : index
    %c0_4 = arith.constant 0 : index
    %2 = vector.load %arg2[%c0_3, %c0_4] : memref<8x128xf32, #tpu.memory_space<vmem>>, vector<8x128xf32>
    %3 = arith.negf %2 : vector<8x128xf32>
    %4 = math.exp %3 : vector<8x128xf32>
    %cst = arith.constant 1.000000e+00 : f32
    %5 = vector.broadcast %cst : f32 to vector<8x128xf32>
    %6 = arith.addf %5, %4 : vector<8x128xf32>
    %7 = arith.divf %5, %6 : vector<8x128xf32>
    %cst_5 = arith.constant 1.000000e+00 : f32
    %8 = vector.broadcast %cst_5 : f32 to vector<8x128xf32>
    %9 = arith.mulf %7, %8 : vector<8x128xf32>
    %cst_6 = arith.constant 1.703000e+00 : f32
    %10 = vector.broadcast %cst_6 : f32 to vector<8x128xf32>
    %11 = arith.mulf %10, %9 : vector<8x128xf32>
    %12 = arith.subf %0, %1 : vector<8x128xf32>
    %13 = arith.mulf %11, %12 : vector<8x128xf32>
    %14 = arith.negf %13 : vector<8x128xf32>
    %15 = math.exp %14 : vector<8x128xf32>
    %cst_7 = arith.constant 1.000000e+00 : f32
    %16 = vector.broadcast %cst_7 : f32 to vector<8x128xf32>
    %17 = arith.addf %16, %15 : vector<8x128xf32>
    %18 = arith.divf %16, %17 : vector<8x128xf32>
    %c0_8 = arith.constant 0 : index
    %c0_9 = arith.constant 0 : index
    %19 = vector.load %arg4[%c0_8, %c0_9] : memref<8x128xf32, #tpu.memory_space<vmem>>, vector<8x128xf32>
    tpu.vector_store %arg4[%c0_8, %c0_9], %18 {strides = array<i32>} : memref<8x128xf32, #tpu.memory_space<vmem>>, vector<8x128xf32>,
    return
  }
  func.func @transform_0(%arg0: i32) -> (i32, i32) {
    %c0_i32 = arith.constant 0 : i32
    %c0_i32_0 = arith.constant 0 : i32
    return %arg0, %c0_i32 : i32, i32
  }
  func.func @transform_1(%arg0: i32) -> (i32, i32) {
    %c0_i32 = arith.constant 0 : i32
    %c0_i32_0 = arith.constant 0 : i32
    return %arg0, %c0_i32 : i32, i32
  }
  func.func @transform_2(%arg0: i32) -> (i32, i32) {
    %c0_i32 = arith.constant 0 : i32
    %c0_i32_0 = arith.constant 0 : i32
    return %arg0, %c0_i32 : i32, i32
  }
  func.func @transform_3(%arg0: i32) -> (i32, i32) {
    %c0_i32 = arith.constant 0 : i32
    %c0_i32_0 = arith.constant 0 : i32
    return %arg0, %c0_i32 : i32, i32
  }
}

</mosaic_0001>

<bundles_post_ra>
// kernel: tpu_custom_call.1
= control target key start
LH: loop header
LB: loop body
LE: loop exit
PB: predicated region body
PF: predicated region fallthrough
CT: control target
= control target key end

     0   :  { %s4_s12 = sld [smem:[#allocation0]]   ;;  %s277_s0 = inlined_call_operand.hbm [shape: f32[8,128], index: 0, kind: input, shape index: {}]   ;;  %s278_s1 = inlined_call_operand.hbm [shape: f32[8,128], index: 1, kind: input, shape index: {}]   ;;  %s279_s2 = inlined_call_operand.hbm [shape: f32[8,128], index: 2, kind: input, shape index: {}]   ;;  %s280_s3 = inlined_call_operand.hbm [shape: f32[8,128], index: 3, kind: output, shape index: {}]  }
   0x1   :  { %8 = vsyncpa [#allocation3], 0 }
   0x2   :  { %9 = vsyncpa [#allocation6], 0 }
   0x6   :  { %s237_s13 = sshll.u32 %s4_s12, 7 }
   0x7   :  { %10 = vsyncpa [#allocation4], 0  ;;  %s29_s16 = scalar_lea.hbm %s278_s1, %s237_s13  ;;  %s213_s17 = smov [#allocation5]  }
   0x8   :  { %s31_s18 = sshll.u32 %s213_s17, 4  ;;  %s247_s21 = scalar_lea.hbm %s277_s0, %s237_s13  ;;  %s32_s18 = int_to_ptr.vmem [resolvable:$true] %s31_s18 }
   0x9   :  { %s119_s22 = scalar_lea.hbm %s29_s16, 128  ;;  %s121_s25 = scalar_lea.hbm %s278_s1, 128 }
   0xa   :  { %p120_p0 = scmp.ne.s32.totalorder %s29_s16, %s119_s22  ;;  %p123_p1 = scmp.lt.s32.totalorder %s121_s25, %s119_s22 }
   0xc   :  { %p125_p2 = pnand %p123_p1, %p120_p0 }
   0xe   :  { %128 = shalt.err (!%p125_p2)
}
   0xf   :  { %s129_s26 = scalar_lea.vmem %s32_s18, 128  ;;  %p134_p4 = scmp.lt.s32.totalorder %s32_s18, %s32_s18 }
  0x10   :  { %p130_p3 = scmp.ne.s32.totalorder %s32_s18, %s129_s26  ;;  %p135_p5 = scmp.lt.s32.totalorder %s129_s26, %s129_s26 }
  0x12   :  { %p136_p6 = por %p135_p5, %p134_p4 }
  0x14   :  { %p137_p7 = pnand %p136_p6, %p130_p3 }
  0x16   :  { %140 = shalt.err (!%p137_p7)
}
  0x17   :  { %34 = dma.hbm_to_vmem [thread:$0]  %s29_s16, 128, %s32_s18, [#allocation6]  }
  0x18   :  { %s256_s29 = scalar_lea.hbm %s279_s2, %s237_s13  ;;  %s214_s1 = smov [#allocation2]  }
  0x19   :  { %s19_s30 = sshll.u32 %s214_s1, 4  ;;  %s215_s4 = smov [#allocation7]   ;;  %s20_s30 = int_to_ptr.vmem [resolvable:$true] %s19_s30 }
  0x1a   :  { %s43_s5 = sshll.u32 %s215_s4, 4  ;;  %s141_s6 = scalar_lea.hbm %s247_s21, 128  ;;  %s44_s5 = int_to_ptr.vmem [resolvable:$true] %s43_s5 }
  0x1b   :  { %p142_p8 = scmp.ne.s32.totalorder %s247_s21, %s141_s6  ;;  %s143_s9 = scalar_lea.hbm %s277_s0, 128 }
  0x1c   :  { %p145_p9 = scmp.lt.s32.totalorder %s143_s9, %s141_s6 }
  0x1e   :  { %p147_p10 = pnand %p145_p9, %p142_p8 }
  0x20   :  { %150 = shalt.err (!%p147_p10)
}
  0x21   :  { %s151_s10 = scalar_lea.vmem %s20_s30, 128  ;;  %p156_p12 = scmp.lt.s32.totalorder %s20_s30, %s20_s30 }
  0x22   :  { %p152_p11 = scmp.ne.s32.totalorder %s20_s30, %s151_s10  ;;  %p157_p13 = scmp.lt.s32.totalorder %s151_s10, %s151_s10 }
  0x24   :  { %p158_p0 = por %p157_p13, %p156_p12 }
  0x26   :  { %p159_p1 = pnand %p158_p0, %p152_p11 }
  0x28   :  { %162 = shalt.err (!%p159_p1)
}
  0x29   :  { %22 = dma.hbm_to_vmem [thread:$0]  %s247_s21, 128, %s20_s30, [#allocation3]  }
  0x2a   :  { %s163_s11 = scalar_lea.hbm %s256_s29, 128  ;;  %s165_s0 = scalar_lea.hbm %s279_s2, 128 }
  0x2b   :  { %p164_p2 = scmp.ne.s32.totalorder %s256_s29, %s163_s11  ;;  %p167_p3 = scmp.lt.s32.totalorder %s165_s0, %s163_s11 }
  0x2d   :  { %p169_p4 = pnand %p167_p3, %p164_p2 }
  0x2f   :  { %172 = shalt.err (!%p169_p4)
}
  0x30   :  { %s173_s15 = scalar_lea.vmem %s44_s5, 128  ;;  %p178_p6 = scmp.lt.s32.totalorder %s44_s5, %s44_s5 }
  0x31   :  { %p174_p5 = scmp.ne.s32.totalorder %s44_s5, %s173_s15  ;;  %p179_p7 = scmp.lt.s32.totalorder %s173_s15, %s173_s15 }
  0x33   :  { %p180_p8 = por %p179_p7, %p178_p6 }
  0x35   :  { %p181_p9 = pnand %p180_p8, %p174_p5 }
  0x37   :  { %184 = shalt.err (!%p181_p9)
}
  0x38   :  { %46 = dma.hbm_to_vmem [thread:$0]  %s256_s29, 128, %s44_s5, [#allocation6]  }
  0x39   :  { %207 = dma.done.wait [#allocation3], 128  }
  0x3a   :  { %208 = vsyncadd [#allocation3], 4294967168 }
  0x3b   :  { %209 = dma.done.wait [#allocation6], 256  }
  0x3c   :  { %210 = vsyncadd [#allocation6], 4294967040  ;;  %v58_v0 = vld [vmem:[#allocation5] sm:$0xff]  ;;  %v56_v4 = vld [vmem:[#allocation2] sm:$0xff]  ;;  %s216_s2 = smov [#allocation8]   ;;  %s81_s19 = scalar_lea.hbm %s280_s3, %s237_s13 }
  0x3d   :  { %v104_v1 = vmul.f32 -1.442695, %v58_v0  ;;  %v57_v5 = vld [vmem:[#allocation7] sm:$0xff]  ;;  %s83_s16 = sshll.u32 %s216_s2, 4  ;;  %s84_s16 = int_to_ptr.vmem [resolvable:$true] %s83_s16 }
  0x3e   :  { %v66_v6 = vsub.f32 %v56_v4, %v57_v5  ;;  %s185_s20 = scalar_lea.vmem %s84_s16, 128  ;;  %p190_p11 = scmp.lt.s32.totalorder %s84_s16, %s84_s16 }
  0x3f   :  { %111 = vpow2.f32 %v104_v1  ;;  %p186_p10 = scmp.ne.s32.totalorder %s84_s16, %s185_s20  ;;  %p191_p12 = scmp.lt.s32.totalorder %s185_s20, %s185_s20 }
  0x41   :  { %p192_p13 = por %p191_p12, %p190_p11 }
  0x43   :  { %p193_p0 = pnand %p192_p13, %p186_p10 }
  0x4c   :  { %v112_v2 = vpop.eup %111 }
  0x4d   :  { %v62_v3 = vadd.f32 1.0, %v112_v2 }
  0x4f   :  { %113 = vrcp.f32 %v62_v3 }
  0x5c   :  { %v114_v7 = vpop.eup %113 }
  0x5d   :  { %v65_v8 = vmul.f32 1.703, %v114_v7 }
  0x5f   :  { %v67_v9 = vmul.f32 %v66_v6, %v65_v8 }
  0x61   :  { %v105_v10 = vmul.f32 -1.442695, %v67_v9 }
  0x63   :  { %115 = vpow2.f32 %v105_v10 }
  0x70   :  { %v116_v11 = vpop.eup %115 }
  0x71   :  { %v71_v12 = vadd.f32 1.0, %v116_v11 }
  0x73   :  { %117 = vrcp.f32 %v71_v12 }
  0x80   :  { %v118_v13 = vpop.eup %117 }
  0x81   :  { %74 = vst [vmem:[#allocation8] sm:$0xff] %v118_v13 }
  0x82   :  { %196 = shalt.err (!%p193_p0)
}
  0x83   :  { %s197_s21 = scalar_lea.hbm %s81_s19, 128  ;;  %s199_s24 = scalar_lea.hbm %s280_s3, 128 }
  0x84   :  { %p198_p1 = scmp.ne.s32.totalorder %s81_s19, %s197_s21  ;;  %p201_p2 = scmp.lt.s32.totalorder %s199_s24, %s197_s21 }
  0x86   :  { %p203_p3 = pnand %p201_p2, %p198_p1 }
  0x88   :  { %206 = shalt.err (!%p203_p3)
}
  0x89   :  { %86 = dma.vmem_to_hbm [thread:$0]  %s84_s16, 128, %s81_s19, [#allocation4]  }
  0x8a   :  { %211 = dma.done.wait [#allocation4], 128  }
  0x8b   :  { %212 = vsyncadd [#allocation4], 4294967168 }
  0x8c   :  { %90 = vsyncpa [#allocation3], 1 }
  0x8d   :  { %91 = vsyncpa [#allocation6], 1 }
  0x8e   :  { %92 = vsyncpa [#allocation4], 1 }

// kernel: tpu_custom_call.1
= control target key start
LH: loop header
LB: loop body
LE: loop exit
PB: predicated region body
PF: predicated region fallthrough
CT: control target
= control target key end

     0   :  { %8 = vsyncpa [#allocation3], 0  ;;  %s221_s0 = inlined_call_operand.hbm [shape: f32[8,128], index: 0, kind: input, shape index: {}]   ;;  %s222_s1 = inlined_call_operand.hbm [shape: f32[8,128], index: 1, kind: input, shape index: {}]   ;;  %s223_s2 = inlined_call_operand.hbm [shape: f32[8,128], index: 2, kind: input, shape index: {}]   ;;  %s224_s3 = inlined_call_operand.hbm [shape: f32[8,128], index: 3, kind: output, shape index: {}]  }
   0x1   :  { %9 = vsyncpa [#allocation6], 0 }
   0x2   :  { %10 = vsyncpa [#allocation4], 0  ;;  %s185_s12 = smov [#allocation5]   ;;  %s186_s14 = smov [#allocation2]  }
   0x3   :  { %s27_s13 = sshll.u32 %s185_s12, 4  ;;  %s17_s15 = sshll.u32 %s186_s14, 4  ;;  %s28_s13 = int_to_ptr.vmem [resolvable:$true] %s27_s13  ;;  %s18_s15 = int_to_ptr.vmem [resolvable:$true] %s17_s15 }
   0x4   :  { %s107_s16 = scalar_lea.vmem %s28_s13, 128  ;;  %p112_p1 = scmp.lt.s32.totalorder %s28_s13, %s28_s13 }
   0x5   :  { %p108_p0 = scmp.ne.s32.totalorder %s28_s13, %s107_s16  ;;  %p113_p2 = scmp.lt.s32.totalorder %s107_s16, %s107_s16 }
   0x7   :  { %p114_p3 = por %p113_p2, %p112_p1 }
   0x9   :  { %p115_p4 = pnand %p114_p3, %p108_p0 }
   0xb   :  { %118 = shalt.err (!%p115_p4)
}
   0xc   :  { %30 = dma.hbm_to_vmem [thread:$0]  %s222_s1, 128, %s28_s13, [#allocation6]  }
   0xd   :  { %s127_s19 = scalar_lea.vmem %s18_s15, 128  ;;  %p132_p6 = scmp.lt.s32.totalorder %s18_s15, %s18_s15 }
   0xe   :  { %p128_p5 = scmp.ne.s32.totalorder %s18_s15, %s127_s19  ;;  %p133_p7 = scmp.lt.s32.totalorder %s127_s19, %s127_s19 }
  0x10   :  { %p134_p8 = por %p133_p7, %p132_p6 }
  0x12   :  { %p135_p9 = pnand %p134_p8, %p128_p5 }
  0x14   :  { %138 = shalt.err (!%p135_p9)
}
  0x15   :  { %20 = dma.hbm_to_vmem [thread:$0]  %s221_s0, 128, %s18_s15, [#allocation3]  }
  0x16   :  { %s187_s22 = smov [#allocation7]  }
  0x17   :  { %s37_s23 = sshll.u32 %s187_s22, 4  ;;  %s38_s23 = int_to_ptr.vmem [resolvable:$true] %s37_s23 }
  0x18   :  { %s147_s24 = scalar_lea.vmem %s38_s23, 128  ;;  %p152_p11 = scmp.lt.s32.totalorder %s38_s23, %s38_s23 }
  0x19   :  { %p148_p10 = scmp.ne.s32.totalorder %s38_s23, %s147_s24  ;;  %p153_p12 = scmp.lt.s32.totalorder %s147_s24, %s147_s24 }
  0x1b   :  { %p154_p13 = por %p153_p12, %p152_p11 }
  0x1d   :  { %p155_p0 = pnand %p154_p13, %p148_p10 }
  0x1f   :  { %158 = shalt.err (!%p155_p0)
}
  0x20   :  { %40 = dma.hbm_to_vmem [thread:$0]  %s223_s2, 128, %s38_s23, [#allocation6]  }
  0x21   :  { %179 = dma.done.wait [#allocation3], 128  }
  0x22   :  { %180 = vsyncadd [#allocation3], 4294967168 }
  0x23   :  { %181 = dma.done.wait [#allocation6], 256  }
  0x24   :  { %182 = vsyncadd [#allocation6], 4294967040  ;;  %v52_v0 = vld [vmem:[#allocation5] sm:$0xff]  ;;  %v50_v4 = vld [vmem:[#allocation2] sm:$0xff]  ;;  %s188_s0 = smov [#allocation8]  }
  0x25   :  { %v85_v1 = vmul.f32 -1.442695, %v52_v0  ;;  %v51_v5 = vld [vmem:[#allocation7] sm:$0xff]  ;;  %s75_s2 = sshll.u32 %s188_s0, 4  ;;  %s76_s2 = int_to_ptr.vmem [resolvable:$true] %s75_s2 }
  0x26   :  { %v60_v6 = vsub.f32 %v50_v4, %v51_v5  ;;  %s159_s26 = scalar_lea.vmem %s76_s2, 128  ;;  %p164_p2 = scmp.lt.s32.totalorder %s76_s2, %s76_s2 }
  0x27   :  { %91 = vpow2.f32 %v85_v1  ;;  %p160_p1 = scmp.ne.s32.totalorder %s76_s2, %s159_s26  ;;  %p165_p3 = scmp.lt.s32.totalorder %s159_s26, %s159_s26 }
  0x29   :  { %p166_p4 = por %p165_p3, %p164_p2 }
  0x2b   :  { %p167_p5 = pnand %p166_p4, %p160_p1 }
  0x34   :  { %v92_v2 = vpop.eup %91 }
  0x35   :  { %v56_v3 = vadd.f32 1.0, %v92_v2 }
  0x37   :  { %93 = vrcp.f32 %v56_v3 }
  0x44   :  { %v94_v7 = vpop.eup %93 }
  0x45   :  { %v59_v8 = vmul.f32 1.703, %v94_v7 }
  0x47   :  { %v61_v9 = vmul.f32 %v60_v6, %v59_v8 }
  0x49   :  { %v86_v10 = vmul.f32 -1.442695, %v61_v9 }
  0x4b   :  { %95 = vpow2.f32 %v86_v10 }
  0x58   :  { %v96_v11 = vpop.eup %95 }
  0x59   :  { %v65_v12 = vadd.f32 1.0, %v96_v11 }
  0x5b   :  { %97 = vrcp.f32 %v65_v12 }
  0x68   :  { %v98_v13 = vpop.eup %97 }
  0x69   :  { %68 = vst [vmem:[#allocation8] sm:$0xff] %v98_v13 }
  0x6a   :  { %170 = shalt.err (!%p167_p5)
}
  0x6b   :  { %78 = dma.vmem_to_hbm [thread:$0]  %s76_s2, 128, %s224_s3, [#allocation4]  }
  0x6c   :  { %183 = dma.done.wait [#allocation4], 128  }
  0x6d   :  { %184 = vsyncadd [#allocation4], 4294967168 }
  0x6e   :  { %82 = vsyncpa [#allocation3], 1 }
  0x6f   :  { %83 = vsyncpa [#allocation6], 1 }
  0x70   :  { %84 = vsyncpa [#allocation4], 1 }

</bundles_post_ra>
